<compile_context>
chip_gen: v7x
topology: tpu7x:2x2x1
jax: 0.10.0
libtpu: 0.0.40
codegen_flags: <defaults>
</compile_context>

<pallas_src>
import math

import jax
import jax.numpy as jnp
from jax import lax
from jax.experimental import pallas as pl
from jax.experimental.pallas import tpu as pltpu


def _make_kernel(block_rows, total_rows, lane_partial_out):
    """Kernel closure over static tiling parameters."""
    needs_mask = (total_rows % block_rows) != 0

    def kernel(true_ref, est_ref, out_ref):
        # Native dtype on the wire; upcast to f32 on the VPU.
        eps = est_ref[...].astype(jnp.float32) - true_ref[...].astype(jnp.float32)
        # |where(eps>=0, .5*eps, 0) + where(eps<0, 2*eps, 0)| == max(.5*eps, -2*eps)
        contrib = jnp.maximum(0.5 * eps, -2.0 * eps)

        if needs_mask:
            # Partial last row-block: zero the rows beyond the real extent.
            row_ids = (pl.program_id(0) * block_rows
                       + lax.broadcasted_iota(jnp.int32, contrib.shape, 0))
            contrib = jnp.where(row_ids < total_rows, contrib, 0.0)

        # Sublane-only reduction -> (1, M) lane partials.
        col = jnp.sum(contrib, axis=0, keepdims=True)

        rows = lax.broadcasted_iota(jnp.int32, out_ref.shape, 0)
        if lane_partial_out:
            # M == 128: drop the lane partials into row 0 of this tile's
            # private (8, 128) output block; JAX does the cross-lane sum.
            out_ref[...] = jnp.where(rows == 0, col, 0.0)
        else:
            # Non-lane-dense trailing dim: finish the reduce to a scalar and
            # one-hot it into element (0, 0).
            total = jnp.sum(col)
            cols = lax.broadcasted_iota(jnp.int32, out_ref.shape, 1)
            out_ref[...] = jnp.where((rows == 0) & (cols == 0), total, 0.0)

    return kernel


def apsr_loss(true_clean_spec, estimated_clean_spec, *, block_rows=4096):
    """Pallas implementation of APSRLoss.forward (mean reduction)."""
    assert true_clean_spec.shape == estimated_clean_spec.shape
    shape = true_clean_spec.shape
    n = int(math.prod(shape)) if shape else 1
    lanes = 128

    # Free (metadata-only) 2-D view: lane-dense (L, 128) when possible,
    # otherwise keep the full trailing dim (divisible-or-equal rule).
    if n % lanes == 0:
        m = lanes
    elif len(shape) >= 1:
        m = int(shape[-1])
    else:
        m = 1
    L = n // m

    t2 = true_clean_spec.reshape(L, m)
    e2 = estimated_clean_spec.reshape(L, m)

    # Target ~block_rows*128 elements per input per grid step (default 4096*128
    # f32 = 2 MiB/input/buffer -> 8 MiB double-buffered, fits v5e's 16 MiB
    # default scoped VMEM; raise block_rows on v6e/v7x if desired).
    target_rows = max(1, (int(block_rows) * lanes) // m)
    if target_rows >= L or L <= 8:
        bl = L                                    # one full-extent block
    else:
        bl = max(8, min((target_rows // 8) * 8, L))
    num_tiles = -(-L // bl)

    itemsize = jnp.dtype(true_clean_spec.dtype).itemsize
    out_bytes = num_tiles * 8 * lanes * 4
    cost = pl.CostEstimate(
        flops=4 * n,
        transcendentals=0,
        bytes_accessed=2 * n * itemsize + out_bytes,
    )

    partials = pl.pallas_call(
        _make_kernel(bl, L, m == lanes),
        out_shape=jax.ShapeDtypeStruct((num_tiles * 8, lanes), jnp.float32),
        grid_spec=pltpu.PrefetchScalarGridSpec(
            num_scalar_prefetch=0,
            grid=(num_tiles,),
            in_specs=[
                pl.BlockSpec((bl, m), lambda i: (i, 0)),
                pl.BlockSpec((bl, m), lambda i: (i, 0)),
            ],
            out_specs=pl.BlockSpec((8, lanes), lambda i: (i, 0)),
        ),
        compiler_params=pltpu.CompilerParams(
            dimension_semantics=("parallel",),   # independent tiles -> both TCs on v7x
        ),
        cost_estimate=cost,
    )(t2, e2)

    # L1Loss default reduction: mean over every (original) element.
    return jnp.sum(partials) / jnp.float32(n)


def _reference(true_clean_spec, estimated_clean_spec):
    eps = estimated_clean_spec - true_clean_spec
    over = jnp.where(eps >= 0, 0.5 * eps, 0.0)
    under = jnp.where(eps < 0, 2.0 * eps, 0.0)
    return jnp.mean(jnp.abs(over + under))


if __name__ == "__main__":
    key = jax.random.PRNGKey(0)
    k1, k2, k3, k4, k5, k6 = jax.random.split(key, 6)

    # 1) Small spectrogram-like shape (batch, time, freq); 128-aligned total,
    #    single tile, default block_rows.
    B, T, F = 2, 8, 32
    true_clean = jax.random.normal(k1, (B, T, F), dtype=jnp.float32)
    est_clean = jax.random.normal(k2, (B, T, F), dtype=jnp.float32)
    loss = apsr_loss(true_clean, est_clean)
    jax.block_until_ready(loss)
    ref = _reference(true_clean, est_clean)
    assert jnp.allclose(loss, ref, rtol=1e-5, atol=1e-6), (loss, ref)

    # 2) 128-aligned, multiple parallel tiles (lane-partial output path).
    tc2 = jax.random.normal(k3, (4, 64, 128), dtype=jnp.float32)
    ec2 = jax.random.normal(k4, (4, 64, 128), dtype=jnp.float32)
    loss2 = apsr_loss(tc2, ec2, block_rows=64)
    jax.block_until_ready(loss2)
    ref2 = _reference(tc2, ec2)
    assert jnp.allclose(loss2, ref2, rtol=1e-5, atol=1e-6), (loss2, ref2)

    # 3) Non-128-aligned STFT-like F=257: no padding, full trailing dim blocks,
    #    partial last row-block exercised via in-kernel masking.
    tc3 = jax.random.normal(k5, (2, 33, 257), dtype=jnp.float32)
    ec3 = jax.random.normal(k6, (2, 33, 257), dtype=jnp.float32)
    loss3 = apsr_loss(tc3, ec3, block_rows=16)
    jax.block_until_ready(loss3)
    ref3 = _reference(tc3, ec3)
    assert jnp.allclose(loss3, ref3, rtol=1e-5, atol=1e-6), (loss3, ref3)

    print("KERNEL_OK")
</pallas_src>

<mosaic_0001>
module attributes {stable_mosaic.version = 11 : i64} {
  func.func @kernel(%arg0: i32, %arg1: memref<4x128xf32, #tpu.memory_space<vmem>>, %arg2: memref<4x128xf32, #tpu.memory_space<vmem>>, %arg3: memref<8x128xf32, #tpu.memory_space<vmem>>) attributes {dimension_semantics = [#tpu.dimension_semantics<parallel>], iteration_bounds = array<i64: 1>, scalar_prefetch = 0 : i64, scratch_operands = 0 : i64, tpu.core_type = #tpu.core_type<tc>, window_params = [{transform_indices = @transform_0, window_bounds = array<i64: 4, 128>}, {transform_indices = @transform_1, window_bounds = array<i64: 4, 128>}, {transform_indices = @transform_2, window_bounds = array<i64: 8, 128>}]} {
    %c0 = arith.constant 0 : index
    %c0_0 = arith.constant 0 : index
    %0 = vector.load %arg2[%c0, %c0_0] : memref<4x128xf32, #tpu.memory_space<vmem>>, vector<4x128xf32>
    %c0_1 = arith.constant 0 : index
    %c0_2 = arith.constant 0 : index
    %1 = vector.load %arg1[%c0_1, %c0_2] : memref<4x128xf32, #tpu.memory_space<vmem>>, vector<4x128xf32>
    %2 = arith.subf %0, %1 : vector<4x128xf32>
    %cst = arith.constant 5.000000e-01 : f32
    %3 = vector.broadcast %cst : f32 to vector<4x128xf32>
    %4 = arith.mulf %3, %2 : vector<4x128xf32>
    %cst_3 = arith.constant -2.000000e+00 : f32
    %5 = vector.broadcast %cst_3 : f32 to vector<4x128xf32>
    %6 = arith.mulf %5, %2 : vector<4x128xf32>
    %7 = arith.maximumf %4, %6 : vector<4x128xf32>
    %cst_4 = arith.constant dense<0.000000e+00> : vector<128xf32>
    %8 = vector.multi_reduction <add>, %7, %cst_4 [0] : vector<4x128xf32> to vector<128xf32>
    %9 = vector.shape_cast %8 : vector<128xf32> to vector<1x128xf32>
    %10 = tpu.iota {dimensions = array<i32: 0>} : vector<8x128xi32>
    %c0_i32 = arith.constant 0 : i32
    %11 = vector.broadcast %c0_i32 : i32 to vector<8x128xi32>
    %12 = arith.cmpi eq, %10, %11 : vector<8x128xi32>
    %cst_5 = arith.constant 0.000000e+00 : f32
    %13 = vector.shape_cast %9 : vector<1x128xf32> to vector<1x128xf32>
    %14 = vector.broadcast %13 : vector<1x128xf32> to vector<8x128xf32>
    %15 = vector.broadcast %cst_5 : f32 to vector<8x128xf32>
    %16 = arith.select %12, %14, %15 : vector<8x128xi1>, vector<8x128xf32>
    %c0_6 = arith.constant 0 : index
    %c0_7 = arith.constant 0 : index
    %17 = vector.load %arg3[%c0_6, %c0_7] : memref<8x128xf32, #tpu.memory_space<vmem>>, vector<8x128xf32>
    tpu.vector_store %arg3[%c0_6, %c0_7], %16 {strides = array<i32>} : memref<8x128xf32, #tpu.memory_space<vmem>>, vector<8x128xf32>,
    return
  }
  func.func @transform_0(%arg0: i32) -> (i32, i32) {
    %c0_i32 = arith.constant 0 : i32
    %c0_i32_0 = arith.constant 0 : i32
    return %arg0, %c0_i32 : i32, i32
  }
  func.func @transform_1(%arg0: i32) -> (i32, i32) {
    %c0_i32 = arith.constant 0 : i32
    %c0_i32_0 = arith.constant 0 : i32
    return %arg0, %c0_i32 : i32, i32
  }
  func.func @transform_2(%arg0: i32) -> (i32, i32) {
    %c0_i32 = arith.constant 0 : i32
    %c0_i32_0 = arith.constant 0 : i32
    return %arg0, %c0_i32 : i32, i32
  }
}

</mosaic_0001>

<bundles_post_ra>
// kernel: tpu_custom_call.1
= control target key start
LH: loop header
LB: loop body
LE: loop exit
PB: predicated region body
PF: predicated region fallthrough
CT: control target
= control target key end

     0   :  { %7 = vsyncpa [#allocation3], 0  ;;  %s200_s0 = inlined_call_operand.hbm [shape: f32[4,128], index: 0, kind: input, shape index: {}]   ;;  %s201_s1 = inlined_call_operand.hbm [shape: f32[4,128], index: 1, kind: input, shape index: {}]   ;;  %s202_s2 = inlined_call_operand.hbm [shape: f32[8,128], index: 2, kind: output, shape index: {}]  }
   0x1   :  { %8 = vsyncpa [#allocation6], 0 }
   0x2   :  { %9 = vsyncpa [#allocation4], 0  ;;  %s146_s9 = smov [#allocation2]   ;;  %s147_s11 = smov [#allocation5]  }
   0x3   :  { %s16_s10 = sshll.u32 %s146_s9, 4  ;;  %s26_s12 = sshll.u32 %s147_s11, 4  ;;  %s17_s10 = int_to_ptr.vmem [resolvable:$true] %s16_s10  ;;  %s27_s12 = int_to_ptr.vmem [resolvable:$true] %s26_s12 }
   0x4   :  { %s74_s15 = scalar_lea.hbm %s200_s0, 64 }
   0x5   :  { %p75_p0 = scmp.ne.s32.totalorder %s200_s0, %s74_s15  ;;  %p78_p1 = scmp.lt.u32.totalorder %s74_s15, %s200_s0 }
   0x7   :  { %p80_p2 = pnand %p78_p1, %p75_p0 }
   0x9   :  { %83 = shalt.err (!%p80_p2)
}
   0xa   :  { %s84_s20 = scalar_lea.vmem %s17_s10, 64  ;;  %p89_p4 = scmp.lt.s32.totalorder %s17_s10, %s17_s10 }
   0xb   :  { %p85_p3 = scmp.ne.s32.totalorder %s17_s10, %s84_s20  ;;  %p90_p5 = scmp.lt.s32.totalorder %s84_s20, %s84_s20 }
   0xd   :  { %p91_p6 = por %p90_p5, %p89_p4 }
   0xf   :  { %p92_p7 = pnand %p91_p6, %p85_p3 }
  0x11   :  { %95 = shalt.err (!%p92_p7)
}
  0x12   :  { %19 = dma.hbm_to_vmem [thread:$0]  %s200_s0, 64, %s17_s10, [#allocation3]  }
  0x13   :  { %s96_s25 = scalar_lea.hbm %s201_s1, 64 }
  0x14   :  { %p97_p8 = scmp.ne.s32.totalorder %s201_s1, %s96_s25  ;;  %p100_p9 = scmp.lt.u32.totalorder %s96_s25, %s201_s1 }
  0x16   :  { %p102_p10 = pnand %p100_p9, %p97_p8 }
  0x18   :  { %105 = shalt.err (!%p102_p10)
}
  0x19   :  { %s106_s30 = scalar_lea.vmem %s27_s12, 64  ;;  %p111_p12 = scmp.lt.s32.totalorder %s27_s12, %s27_s12 }
  0x1a   :  { %p107_p11 = scmp.ne.s32.totalorder %s27_s12, %s106_s30  ;;  %p112_p13 = scmp.lt.s32.totalorder %s106_s30, %s106_s30 }
  0x1c   :  { %p113_p0 = por %p112_p13, %p111_p12 }
  0x1e   :  { %p114_p1 = pnand %p113_p0, %p107_p11 }
  0x20   :  { %117 = shalt.err (!%p114_p1)
}
  0x21   :  { %29 = dma.hbm_to_vmem [thread:$0]  %s201_s1, 64, %s27_s12, [#allocation6]  }
  0x22   :  { %140 = dma.done.wait [#allocation3], 64  }
  0x23   :  { %141 = vsyncadd [#allocation3], 4294967232 }
  0x24   :  { %142 = dma.done.wait [#allocation6], 64  }
  0x25   :  { %143 = vsyncadd [#allocation6], 4294967232  ;;  %v36_v0 = vld [vmem:[#allocation5] sm:$0xf]  ;;  %v37_v1 = vld [vmem:[#allocation2] sm:$0xf]  ;;  %v50_v8 = vlaneseq }
  0x26   :  { %v38_v2 = vsub.f32 %v36_v0, %v37_v1  ;;  %vm42_vm0 = vcmask 1043456   ;;  %s148_s1 = smov [#allocation7]  }
  0x27   :  { %v51_v11 = vshrl.u32 %v50_v8, 7  ;;  %s61_s4 = sshll.u32 %s148_s1, 4  ;;  %s62_s4 = int_to_ptr.vmem [resolvable:$true] %s61_s4 }
  0x28   :  { %v39_v3 = vmul.f32 0.5, %v38_v2  ;;  %v40_v4 = vmul.f32 -2.0, %v38_v2  ;;  %s118_s5 = scalar_lea.vmem %s62_s4, 128  ;;  %p123_p3 = scmp.lt.s32.totalorder %s62_s4, %s62_s4 }
  0x29   :  { %vm52_vm1 = vcmp.eq.s32.totalorder %v51_v11, 0  ;;  %p119_p2 = scmp.ne.s32.totalorder %s62_s4, %s118_s5  ;;  %p124_p4 = scmp.lt.s32.totalorder %s118_s5, %s118_s5 }
  0x2a   :  { %v41_v5 = vmax.f32 %v39_v3, %v40_v4 }
  0x2b   :  { %p125_p5 = por %p124_p4, %p123_p3 }
  0x2c   :  { %v43_v6 = vsel %vm42_vm0, %v41_v5, 0.0 }
  0x2d   :  { %v44_v7 = vrot.slane %v43_v6, 4  ;;  %p126_p6 = pnand %p125_p5, %p119_p2 }
  0x2f   :  { %v45_v9 = vadd.f32 %v44_v7, %v43_v6 }
  0x31   :  { %v46_v10 = vrot.slane %v45_v9, 2 }
  0x33   :  { %v47_v12 = vadd.f32 %v46_v10, %v45_v9 }
  0x35   :  { %v48_v13 = vrot.slane %v47_v12, 1 }
  0x37   :  { %v49_v14 = vadd.f32 %v48_v13, %v47_v12 }
  0x39   :  { %v53_v15 = vsel %vm52_vm1, %v49_v14, 0.0 }
  0x3a   :  { %54 = vst [vmem:[#allocation7] sm:$0xff] %v53_v15 }
  0x3b   :  { %129 = shalt.err (!%p126_p6)
}
  0x3c   :  { %s130_s8 = scalar_lea.hbm %s202_s2, 128 }
  0x3d   :  { %p131_p7 = scmp.ne.s32.totalorder %s202_s2, %s130_s8  ;;  %p134_p8 = scmp.lt.u32.totalorder %s130_s8, %s202_s2 }
  0x3f   :  { %p136_p9 = pnand %p134_p8, %p131_p7 }
  0x41   :  { %139 = shalt.err (!%p136_p9)
}
  0x42   :  { %64 = dma.vmem_to_hbm [thread:$0]  %s62_s4, 128, %s202_s2, [#allocation4]  }
  0x43   :  { %144 = dma.done.wait [#allocation4], 128  }
  0x44   :  { %145 = vsyncadd [#allocation4], 4294967168 }
  0x45   :  { %68 = vsyncpa [#allocation3], 1 }
  0x46   :  { %69 = vsyncpa [#allocation6], 1 }
  0x47   :  { %70 = vsyncpa [#allocation4], 1 }

</bundles_post_ra>
